<compile_context>
chip_gen: v6e
topology: v6e:2x2x1
jax: 0.10.0
libtpu: 0.0.40
codegen_flags: <defaults>
</compile_context>

<pallas_src>
import jax
import jax.numpy as jnp
from jax.experimental import pallas as pl
from jax.experimental.pallas import tpu as pltpu


def _round_up(x: int, m: int) -> int:
    return ((x + m - 1) // m) * m


def _pick_tile(dim: int, cap_max: int, align: int):
    """Pick (tile, padded_dim): fewest tiles under the cap, then minimal padding."""
    d_al = _round_up(dim, align)
    cap = max((min(cap_max, d_al) // align) * align, align)
    n_tiles = -(-d_al // cap)                      # fewest tiles achievable at the cap
    tile = _round_up(-(-d_al // n_tiles), align)   # smallest aligned tile giving that count
    return tile, tile * n_tiles


def _vmem_limit_bytes(tile_m, tile_n, tk, in_bytes, out_bytes):
    # Double-buffered input tiles + double-buffered output tile + resident accumulator.
    need = (2 * (tile_m * tk + tk * tile_n + tile_n) * in_bytes
            + 2 * tile_m * tile_n * out_bytes
            + tile_m * tile_n * 4)
    limit = max(2 * need, 32 * 1024 * 1024)        # at least the usual scoped default
    try:
        cap = pltpu.get_tpu_info().vmem_capacity_bytes
    except Exception:
        cap = 64 * 1024 * 1024                     # v7x physical (most restrictive)
    return int(min(limit, int(0.9 * cap)))


def _linear_kernel(x_ref, w_ref, b_ref, o_ref, acc_ref):
    # x_ref: [tile_m, tk], w_ref: [tk, tile_n] (pre-transposed weight),
    # b_ref: [1, tile_n] f32, o_ref: [tile_m, tile_n], acc_ref: f32 VMEM scratch.
    k = pl.program_id(2)

    @pl.when(k == 0)
    def _():
        acc_ref[...] = jnp.zeros_like(acc_ref)

    acc_ref[...] += jnp.dot(x_ref[...], w_ref[...],
                            preferred_element_type=jnp.float32)

    @pl.when(k == pl.num_programs(2) - 1)
    def _():
        # Bias added exactly once (on the last K step).
        o_ref[...] = (acc_ref[...] + b_ref[...]).astype(o_ref.dtype)


def make_linear_classification(weight, bias, *, mxu_dtype=None,
                               tile_m_max=1024, tile_n_max=512, tk_max=512):
    """Prepare (pad / cast / transpose) the parameters ONCE; return a jitted forward.

    weight: [C, H] float32 (PyTorch layout)   bias: [C] float32
    forward(x: [B, H]) -> [B, C] float32
    """
    C, H = weight.shape
    assert bias.shape == (C,)

    tile_n, C_pad = _pick_tile(C, tile_n_max, 128)   # lane-dense N tiles
    tk, H_pad = _pick_tile(H, tk_max, 128)           # K tiles (contraction)

    w = weight.astype(mxu_dtype) if mxu_dtype is not None else weight
    # One-time HBM cost: pad and pre-transpose to [H_pad, C_pad] so the kernel
    # runs a plain MXU dot with no per-tile transpose.
    w_t = jnp.asarray(jnp.pad(w, ((0, C_pad - C), (0, H_pad - H))).T)
    b2d = jnp.pad(bias.astype(jnp.float32), (0, C_pad - C)).reshape(1, C_pad)
    w_t, b2d = jax.block_until_ready((w_t, b2d))     # materialize the cache now

    in_bytes = jnp.dtype(mxu_dtype).itemsize if mxu_dtype is not None else 4
    out_bytes = 4  # f32 output

    @jax.jit
    def forward(x):
        B, Hx = x.shape
        assert Hx == H, (Hx, H)
        tile_m, B_pad = _pick_tile(B, tile_m_max, 8)

        xp = x.astype(mxu_dtype) if mxu_dtype is not None else x
        if (B_pad, H_pad) != (B, H):
            xp = jnp.pad(xp, ((0, B_pad - B), (0, H_pad - H)))

        grid = (B_pad // tile_m, C_pad // tile_n, H_pad // tk)

        out = pl.pallas_call(
            _linear_kernel,
            out_shape=jax.ShapeDtypeStruct((B_pad, C_pad), jnp.float32),
            grid_spec=pltpu.PrefetchScalarGridSpec(
                num_scalar_prefetch=0,
                grid=grid,
                in_specs=[
                    # x tile: rows follow M, columns follow K.
                    pl.BlockSpec((tile_m, tk), lambda i, j, k: (i, k)),
                    # pre-transposed weight tile [tk, tile_n]: rows follow K, cols follow N.
                    pl.BlockSpec((tk, tile_n), lambda i, j, k: (k, j)),
                    # bias tile: follows N only.
                    pl.BlockSpec((1, tile_n), lambda i, j, k: (0, j)),
                ],
                out_specs=pl.BlockSpec((tile_m, tile_n), lambda i, j, k: (i, j)),
                scratch_shapes=[pltpu.VMEM((tile_m, tile_n), jnp.float32)],
            ),
            compiler_params=pltpu.CompilerParams(
                dimension_semantics=("parallel", "parallel", "arbitrary"),
                vmem_limit_bytes=_vmem_limit_bytes(tile_m, tile_n, tk,
                                                   in_bytes, out_bytes),
            ),
        )(xp, w_t, b2d)

        return out[:B, :C]

    return forward


# TODO(synk): on v7x, an fp8 weight cache (MXU-native fp8) would halve weight HBM
# traffic again if the accuracy budget allows; not enabled here.


if __name__ == "__main__":
    # Small shapes consistent with the module: batch=8, n_hidden=32, n_class=16.
    batch, n_hidden, n_class = 8, 32, 16

    key = jax.random.PRNGKey(0)
    k_x, k_w, k_b = jax.random.split(key, 3)

    # Deterministic init mimicking nn.Linear's default U(-1/sqrt(H), 1/sqrt(H)).
    bound = 1.0 / (n_hidden ** 0.5)
    weight = jax.random.uniform(
        k_w, (n_class, n_hidden), jnp.float32, minval=-bound, maxval=bound)
    bias = jax.random.uniform(
        k_b, (n_class,), jnp.float32, minval=-bound, maxval=bound)
    x = jax.random.normal(k_x, (batch, n_hidden), jnp.float32)

    ref = x @ weight.T + bias

    # f32 MXU path (default): tight tolerance.
    fwd = make_linear_classification(weight, bias)
    out = jax.block_until_ready(fwd(x))
    assert out.shape == (batch, n_class)
    assert jnp.allclose(out, ref, atol=1e-5, rtol=1e-5)

    # bf16-weight/activation path (v6e/v7x throughput config; f32 accumulation).
    fwd_bf16 = make_linear_classification(weight, bias, mxu_dtype=jnp.bfloat16)
    out_bf16 = jax.block_until_ready(fwd_bf16(x))
    assert jnp.allclose(out_bf16, ref, atol=2e-2, rtol=2e-2)

    print("KERNEL_OK")
</pallas_src>

<mosaic_0001>
module attributes {stable_mosaic.version = 11 : i64} {
  func.func @_linear_kernel(%arg0: i32, %arg1: i32, %arg2: i32, %arg3: memref<8x128xf32, #tpu.memory_space<vmem>>, %arg4: memref<128x128xf32, #tpu.memory_space<vmem>>, %arg5: memref<1x128xf32, #tpu.memory_space<vmem>>, %arg6: memref<8x128xf32, #tpu.memory_space<vmem>>, %arg7: memref<8x128xf32, #tpu.memory_space<vmem>>) attributes {dimension_semantics = [#tpu.dimension_semantics<parallel>, #tpu.dimension_semantics<parallel>, #tpu.dimension_semantics<arbitrary>], iteration_bounds = array<i64: 1, 1, 1>, scalar_prefetch = 0 : i64, scratch_operands = 1 : i64, tpu.core_type = #tpu.core_type<tc>, window_params = [{transform_indices = @transform_0, window_bounds = array<i64: 8, 128>}, {transform_indices = @transform_1, window_bounds = array<i64: 128, 128>}, {transform_indices = @transform_2, window_bounds = array<i64: 1, 128>}, {transform_indices = @transform_3, window_bounds = array<i64: 8, 128>}]} {
    %c0_i32 = arith.constant 0 : i32
    %0 = arith.cmpi eq, %arg2, %c0_i32 : i32
    %1 = arith.extui %0 : i1 to i32
    %c0_i32_0 = arith.constant 0 : i32
    %2 = arith.cmpi ne, %1, %c0_i32_0 : i32
    scf.if %2 {
      %cst_10 = arith.constant 0.000000e+00 : f32
      %12 = vector.broadcast %cst_10 : f32 to vector<8x128xf32>
      %c0_11 = arith.constant 0 : index
      %c0_12 = arith.constant 0 : index
      %13 = vector.load %arg7[%c0_11, %c0_12] : memref<8x128xf32, #tpu.memory_space<vmem>>, vector<8x128xf32>
      tpu.vector_store %arg7[%c0_11, %c0_12], %12 {strides = array<i32>} : memref<8x128xf32, #tpu.memory_space<vmem>>, vector<8x128xf32>,
    } else {
    }
    %c0 = arith.constant 0 : index
    %c0_1 = arith.constant 0 : index
    %3 = vector.load %arg7[%c0, %c0_1] : memref<8x128xf32, #tpu.memory_space<vmem>>, vector<8x128xf32>
    %c0_2 = arith.constant 0 : index
    %c0_3 = arith.constant 0 : index
    %4 = vector.load %arg3[%c0_2, %c0_3] : memref<8x128xf32, #tpu.memory_space<vmem>>, vector<8x128xf32>
    %c0_4 = arith.constant 0 : index
    %c0_5 = arith.constant 0 : index
    %5 = vector.load %arg4[%c0_4, %c0_5] : memref<128x128xf32, #tpu.memory_space<vmem>>, vector<128x128xf32>
    %cst = arith.constant dense<0.000000e+00> : vector<8x128xf32>
    %6 = tpu.matmul %4, %5, %cst {dimension_numbers = #tpu.dot_dimension_numbers<[1], [0], [0], [1], [0, 0, 1, 1], [], []>} : vector<8x128xf32>, vector<128x128xf32>, vector<8x128xf32> -> vector<8x128xf32>
    %7 = arith.addf %3, %6 : vector<8x128xf32>
    %c0_6 = arith.constant 0 : index
    %c0_7 = arith.constant 0 : index
    %8 = vector.load %arg7[%c0_6, %c0_7] : memref<8x128xf32, #tpu.memory_space<vmem>>, vector<8x128xf32>
    tpu.vector_store %arg7[%c0_6, %c0_7], %7 {strides = array<i32>} : memref<8x128xf32, #tpu.memory_space<vmem>>, vector<8x128xf32>,
    %c0_i32_8 = arith.constant 0 : i32
    %9 = arith.cmpi eq, %arg2, %c0_i32_8 : i32
    %10 = arith.extui %9 : i1 to i32
    %c0_i32_9 = arith.constant 0 : i32
    %11 = arith.cmpi ne, %10, %c0_i32_9 : i32
    scf.if %11 {
      %c0_10 = arith.constant 0 : index
      %c0_11 = arith.constant 0 : index
      %12 = vector.load %arg7[%c0_10, %c0_11] : memref<8x128xf32, #tpu.memory_space<vmem>>, vector<8x128xf32>
      %c0_12 = arith.constant 0 : index
      %c0_13 = arith.constant 0 : index
      %13 = vector.load %arg5[%c0_12, %c0_13] : memref<1x128xf32, #tpu.memory_space<vmem>>, vector<1x128xf32>
      %14 = vector.broadcast %13 : vector<1x128xf32> to vector<8x128xf32>
      %15 = arith.addf %12, %14 : vector<8x128xf32>
      %c0_14 = arith.constant 0 : index
      %c0_15 = arith.constant 0 : index
      %16 = vector.load %arg6[%c0_14, %c0_15] : memref<8x128xf32, #tpu.memory_space<vmem>>, vector<8x128xf32>
      tpu.vector_store %arg6[%c0_14, %c0_15], %15 {strides = array<i32>} : memref<8x128xf32, #tpu.memory_space<vmem>>, vector<8x128xf32>,
    } else {
    }
    return
  }
  func.func @transform_0(%arg0: i32, %arg1: i32, %arg2: i32) -> (i32, i32) {
    %c0_i32 = arith.constant 0 : i32
    return %arg0, %arg2 : i32, i32
  }
  func.func @transform_1(%arg0: i32, %arg1: i32, %arg2: i32) -> (i32, i32) {
    %c0_i32 = arith.constant 0 : i32
    return %arg2, %arg1 : i32, i32
  }
  func.func @transform_2(%arg0: i32, %arg1: i32, %arg2: i32) -> (i32, i32) {
    %c0_i32 = arith.constant 0 : i32
    %c0_i32_0 = arith.constant 0 : i32
    return %c0_i32, %arg1 : i32, i32
  }
  func.func @transform_3(%arg0: i32, %arg1: i32, %arg2: i32) -> (i32, i32) {
    %c0_i32 = arith.constant 0 : i32
    return %arg0, %arg1 : i32, i32
  }
}

</mosaic_0001>

<bundles_post_ra>
// kernel: forward.1
= control target key start
LH: loop header
LB: loop body
LE: loop exit
PB: predicated region body
PF: predicated region fallthrough
CT: control target
= control target key end

     0   :  { %8 = vsyncpa [#allocation4], 0  ;;  %s293_s0 = inlined_call_operand.vmem [shape: f32[8,128], index: 0, kind: input, shape index: {}]   ;;  %s294_s1 = inlined_call_operand.hbm [shape: f32[128,128], index: 1, kind: input, shape index: {}]   ;;  %s295_s2 = inlined_call_operand.vmem [shape: f32[1,128], index: 2, kind: input, shape index: {}]   ;;  %s296_s3 = inlined_call_operand.hbm [shape: f32[8,128], index: 3, kind: output, shape index: {}]  }
   0x1   :  { %9 = vsyncpa [#allocation5], 0  ;;  %s255_s12 = smov [#allocation3]  }
   0x2   :  { %s17_s13 = sshll.u32 %s255_s12, 4  ;;  %s18_s13 = int_to_ptr.vmem [resolvable:$true] %s17_s13 }
   0x3   :  { %s219_s14 = scalar_lea.vmem %s18_s13, 2048  ;;  %p224_p1 = scmp.lt.s32.totalorder %s18_s13, %s18_s13 }
   0x4   :  { %p220_p0 = scmp.ne.s32.totalorder %s18_s13, %s219_s14  ;;  %p225_p2 = scmp.lt.s32.totalorder %s219_s14, %s219_s14 }
   0x6   :  { %p226_p3 = por %p225_p2, %p224_p1 }
   0x8   :  { %p227_p4 = pnand %p226_p3, %p220_p0 }
   0xa   :  { %230 = shalt.err (!%p227_p4)
}
   0xb   :  { %s256_s15 = smov 128   ;;  %s257_s16 = smov 8  }
   0xc   :  { %23 = dma.hbm_to_vmem [thread:$0]  %s294_s1, 2048, %s18_s13, [#allocation4], %s256_s15, %s256_s15, %s257_s16  }
   0xd   :  { %251 = dma.done.wait [#allocation4], 2048  }
   0xe   :  { %252 = vsyncadd [#allocation4], 4294965248  ;;  %v258_v0 = vmov 0.0   ;;  %vm259_vm0 = vmmov 0   ;;  %v51_v1 = vld [vmem:[#allocation3 + $0x78] sm:$0xff]  ;;  %v50_v2 = vld [vmem:[#allocation3 + $0x70] sm:$0xff] }
   0xf   :  { %170 = vmatprep.subr.mxu0 %v258_v0  ;;  %202 = vmatprep.mubr.msk.f32.mxu0 %vm259_vm0, %v258_v0  ;;  %v49_v3 = vld [vmem:[#allocation3 + $0x68] sm:$0xff]  ;;  %v48_v4 = vld [vmem:[#allocation3 + $0x60] sm:$0xff]  ;;  %v47_v5 = vld [vmem:[#allocation3 + $0x58] sm:$0xff]  ;;  %s260_s22 = smov [#allocation6]  }
  0x10   :  { %171 = vmatpush3.msra.mxu0 %v51_v1  ;;  %v46_v6 = vld [vmem:[#allocation3 + $0x50] sm:$0xff]  ;;  %v45_v7 = vld [vmem:[#allocation3 + $0x48] sm:$0xff]  ;;  %v44_v8 = vld [vmem:[#allocation3 + $0x40] sm:$0xff]  ;;  %s143_s23 = sshll.u32 %s260_s22, 4  ;;  %s144_s23 = int_to_ptr.vmem [resolvable:$true] %s143_s23 }
  0x11   :  { %172 = vmatprep.subr.mxu0 %v258_v0  ;;  %v43_v9 = vld [vmem:[#allocation3 + $0x38] sm:$0xff]  ;;  %v42_v10 = vld [vmem:[#allocation3 + $0x30] sm:$0xff]  ;;  %v41_v11 = vld [vmem:[#allocation3 + $0x28] sm:$0xff]  ;;  %s231_s24 = scalar_lea.vmem %s144_s23, 128  ;;  %p236_p6 = scmp.lt.s32.totalorder %s144_s23, %s144_s23 }
  0x12   :  { %173 = vmatpush3.msra.mxu0 %v50_v2  ;;  %v40_v12 = vld [vmem:[#allocation3 + $0x20] sm:$0xff]  ;;  %v39_v13 = vld [vmem:[#allocation3 + $0x18] sm:$0xff]  ;;  %v38_v14 = vld [vmem:[#allocation3 + $0x10] sm:$0xff]  ;;  %p232_p5 = scmp.ne.s32.totalorder %s144_s23, %s231_s24  ;;  %p237_p7 = scmp.lt.s32.totalorder %s231_s24, %s231_s24 }
  0x13   :  { %174 = vmatprep.subr.mxu0 %v258_v0  ;;  %v37_v15 = vld [vmem:[#allocation3 + $0x8] sm:$0xff]  ;;  %v36_v16 = vld [vmem:[#allocation3] sm:$0xff] }
  0x14   :  { %175 = vmatpush3.msra.mxu0 %v49_v3  ;;  %v35_v17 = vld [vmem:[%s293_s0] sm:$0xff]  ;;  %p238_p8 = por %p237_p7, %p236_p6 }
  0x15   :  { %176 = vmatprep.subr.mxu0 %v258_v0  ;;  %v152_v18 = vld [vmem:[%s295_s2] ss:$0 sm:$0xff] }
  0x16   :  { %177 = vmatpush3.msra.mxu0 %v48_v4  ;;  %p239_p9 = pnand %p238_p8, %p232_p5 }
  0x17   :  { %178 = vmatprep.subr.mxu0 %v258_v0 }
  0x18   :  { %179 = vmatpush3.msra.mxu0 %v47_v5 }
  0x19   :  { %180 = vmatprep.subr.mxu0 %v258_v0 }
  0x1a   :  { %181 = vmatpush3.msra.mxu0 %v46_v6 }
  0x1b   :  { %182 = vmatprep.subr.mxu0 %v258_v0 }
  0x1c   :  { %183 = vmatpush3.msra.mxu0 %v45_v7 }
  0x1d   :  { %184 = vmatprep.subr.mxu0 %v258_v0 }
  0x1e   :  { %185 = vmatpush3.msra.mxu0 %v44_v8 }
  0x1f   :  { %186 = vmatprep.subr.mxu0 %v258_v0 }
  0x20   :  { %187 = vmatpush3.msra.mxu0 %v43_v9 }
  0x21   :  { %188 = vmatprep.subr.mxu0 %v258_v0 }
  0x22   :  { %189 = vmatpush3.msra.mxu0 %v42_v10 }
  0x23   :  { %190 = vmatprep.subr.mxu0 %v258_v0 }
  0x24   :  { %191 = vmatpush3.msra.mxu0 %v41_v11 }
  0x25   :  { %192 = vmatprep.subr.mxu0 %v258_v0 }
  0x26   :  { %193 = vmatpush3.msra.mxu0 %v40_v12 }
  0x27   :  { %194 = vmatprep.subr.mxu0 %v258_v0 }
  0x28   :  { %195 = vmatpush3.msra.mxu0 %v39_v13 }
  0x29   :  { %196 = vmatprep.subr.mxu0 %v258_v0 }
  0x2a   :  { %197 = vmatpush3.msra.mxu0 %v38_v14 }
  0x2b   :  { %198 = vmatprep.subr.mxu0 %v258_v0 }
  0x2c   :  { %199 = vmatpush3.msra.mxu0 %v37_v15 }
  0x2d   :  { %200 = vmatprep.subr.mxu0 %v258_v0 }
  0x2e   :  { %201 = vmatpush3.msra.mxu0 %v36_v16 }
  0x2f   :  { %203 = vmatmul.mubr.f32.vlgmr.msra.gmra.mxu0 %v35_v17 }
  0xef   :  { %v118_v19 = vpop.f32.mrf.mxu0 }
  0xf0   :  { %v135_v20 = vadd.f32 %v152_v18, %v118_v19 }
  0xf1   :  { %v204_v21 = vpop.f32.mrf.mxu0 }
  0xf2   :  { %136 = vst [vmem:[#allocation6] sm:$0xff] %v135_v20 }
  0xf3   :  { %242 = shalt.err (!%p239_p9)
}
  0xf4   :  { %146 = dma.vmem_to_hbm [thread:$0]  %s144_s23, 128, %s296_s3, [#allocation5]  }
  0xf5   :  { %253 = dma.done.wait [#allocation5], 128  }
  0xf6   :  { %254 = vsyncadd [#allocation5], 4294967168 }
  0xf7   :  { %150 = vsyncpa [#allocation4], 1 }
  0xf8   :  { %151 = vsyncpa [#allocation5], 1 }

</bundles_post_ra>
